<compile_context>
chip_gen: v5e
topology: v5e:2x2
jax: 0.10.0
libtpu: 0.0.40
codegen_flags: <defaults>
</compile_context>

<pallas_src>
import functools

import jax
import jax.numpy as jnp
from jax.experimental import pallas as pl
from jax.experimental.pallas import tpu as pltpu


def make_positional_encoding_table(max_len: int, d_model: int) -> jnp.ndarray:
    """Deterministic sinusoidal table, identical to the PyTorch __init__ buffer
    (stored as (max_len, d_model); the PyTorch buffer is (max_len, 1, d_model))."""
    assert d_model % 2 == 0, "d_model must be even (as in the PyTorch module)"
    position = jnp.arange(max_len, dtype=jnp.float32)[:, None]                  # (L, 1)
    div_term = jnp.exp(
        jnp.arange(0, d_model, 2, dtype=jnp.float32) * (-jnp.log(10000.0) / d_model)
    )                                                                            # (D/2,)
    pe = jnp.zeros((max_len, d_model), jnp.float32)
    pe = pe.at[:, 0::2].set(jnp.sin(position * div_term))
    pe = pe.at[:, 1::2].set(jnp.cos(position * div_term))
    return pe


# ----------------------------------------------------------------------------
# Kernels.  x_ref / o_ref (and m_ref) are lane-dense (TS, B*D) tiles; pe_ref is
# a (TS, D) tile.  The batch broadcast is a statically-unrolled per-batch slice
# add: the slices are zero-cost ref views, so there is no (TS, B*D) broadcast
# temporary and no cross-lane concatenate.
# ----------------------------------------------------------------------------
def _pe_add_kernel(x_ref, pe_ref, o_ref, *, batch: int, d_model: int):
    pe_row = pe_ref[...]                                       # (TS, D)
    for b in range(batch):                                     # static unroll
        sl = slice(b * d_model, (b + 1) * d_model)
        o_ref[:, sl] = x_ref[:, sl] + pe_row


def _pe_add_dropout_kernel(x_ref, pe_ref, m_ref, o_ref, *,
                           batch: int, d_model: int, keep_prob: float):
    # Fused add + inverted dropout, written directly into the output slice.
    pe_row = pe_ref[...]                                       # (TS, D)
    scale = 1.0 / keep_prob
    for b in range(batch):
        sl = slice(b * d_model, (b + 1) * d_model)
        y = (x_ref[:, sl] + pe_row) * scale
        o_ref[:, sl] = jnp.where(m_ref[:, sl] != 0, y, 0.0).astype(o_ref.dtype)


# ----------------------------------------------------------------------------
# Wrapper helpers: per-generation tile / VMEM policy.
# ----------------------------------------------------------------------------
def _sublane_multiple(dtype) -> int:
    # f32 -> 8, bf16 -> 16, int8/uint8/fp8 -> 32 (sub-32-bit dtypes pack along sublanes).
    return max(8, 32 // jnp.dtype(dtype).itemsize)


def _round_up(n: int, m: int) -> int:
    return -(-n // m) * m


def _padded_tile_bytes(rows: int, cols: int, dtype) -> int:
    sub = _sublane_multiple(dtype)
    return _round_up(rows, sub) * _round_up(cols, 128) * jnp.dtype(dtype).itemsize


def _vmem_capacity_bytes() -> int:
    try:
        if pltpu.is_tpu_device():
            cap = getattr(pltpu.get_tpu_info(), "vmem_capacity_bytes", None)
            if cap:
                return int(cap)
    except Exception:
        pass
    return 64 << 20   # conservative fallback: v7x per-TensorCore VMEM


def _choose_tile_rows(n_rows: int, row_bytes: int, sub: int,
                      target_tile_bytes: int) -> int:
    """Rows per grid step so each x/out tile is ~target_tile_bytes, sublane-aligned."""
    ts = max(1, target_tile_bytes // max(1, row_bytes))
    if ts >= n_rows:
        # Whole extent fits in one tile.  Still split it roughly in two so a
        # two-TensorCore part (v7x) can shard the grid under "parallel" semantics.
        if n_rows >= 2 * sub:
            return int(_round_up(-(-n_rows // 2), sub))
        return int(n_rows)                       # tiny input: one full-extent block
    return int(max(sub, (ts // sub) * sub))


# ----------------------------------------------------------------------------
# Public entry point.
# ----------------------------------------------------------------------------
def positional_encoding(
    x: jnp.ndarray,            # (S, B, D)
    pe: jnp.ndarray,           # (max_len, D)
    *,
    dropout_p: float = 0.1,
    training: bool = False,
    rng_key=None,
) -> jnp.ndarray:
    S, B, D = x.shape
    if S > pe.shape[0]:
        raise ValueError(
            f"sequence length {S} exceeds positional table max_len {pe.shape[0]}")

    use_dropout = bool(training) and float(dropout_p) > 0.0

    # NOTE: pe is cast to x.dtype before the add; with a bf16 x PyTorch would
    # promote the add to f32 via the f32 pe buffer.  Documented, not reproduced.
    pe_s = pe[:S].astype(x.dtype)          # (S, D)
    # Lane-dense view.  For unmasked vector stores B*D should be a multiple of 128
    # (typical d_model already is); narrower shapes are correct but use masked stores.
    x2 = x.reshape(S, B * D)

    itemsize = jnp.dtype(x.dtype).itemsize
    sub = _sublane_multiple(x.dtype)
    if use_dropout:
        sub = max(sub, _sublane_multiple(jnp.uint8))   # keep uint8 mask tiles dense too

    cap = _vmem_capacity_bytes()
    # ~4 MiB tiles on a 64 MiB-VMEM part (v7x), ~8 MiB on 128 MiB parts (v5e/v6e).
    target_tile_bytes = int(min(8 << 20, max(2 << 20, cap // 16)))
    ts = _choose_tile_rows(S, B * D * itemsize, sub, target_tile_bytes)
    grid = (pl.cdiv(S, ts),)

    # VMEM accounting: double-buffered x, out, pe (+ mask) tiles with layout padding;
    # the kernel keeps no full-tile temporaries, so this covers everything.
    x_tile = _padded_tile_bytes(ts, B * D, x.dtype)
    pe_tile = _padded_tile_bytes(ts, D, x.dtype)
    m_tile = _padded_tile_bytes(ts, B * D, jnp.uint8) if use_dropout else 0
    need = 2 * (2 * x_tile + pe_tile + m_tile)
    vmem_limit = int(min(max(need + (4 << 20), 16 << 20), (cap * 3) // 4))

    compiler_params = pltpu.CompilerParams(
        dimension_semantics=("parallel",),
        vmem_limit_bytes=vmem_limit,
    )
    out_shape = jax.ShapeDtypeStruct((S, B * D), x.dtype)
    xo_spec = pl.BlockSpec((ts, B * D), lambda i: (i, 0))
    pe_spec = pl.BlockSpec((ts, D), lambda i: (i, 0))
    # NOTE: if the caller can donate x, input_output_aliases={0: 0} would remove
    # the output allocation; skipped here because donation is caller-dependent.

    if not use_dropout:
        out2 = pl.pallas_call(
            functools.partial(_pe_add_kernel, batch=B, d_model=D),
            out_shape=out_shape,
            grid_spec=pltpu.PrefetchScalarGridSpec(
                num_scalar_prefetch=0,
                grid=grid,
                in_specs=[xo_spec, pe_spec],
                out_specs=xo_spec,
            ),
            compiler_params=compiler_params,
        )(x2, pe_s)
    else:
        if rng_key is None:
            rng_key = jax.random.PRNGKey(0)
        keep_prob = 1.0 - float(dropout_p)
        # TODO(synk): torch.nn.Dropout's RNG stream cannot be reproduced bit-exactly;
        # and the on-chip PRNG (pltpu.prng_seed/prng_random_bits), which would avoid
        # streaming this mask from HBM, has no interpret-mode lowering -- so the keep
        # mask is generated host-side with jax.random and streamed as uint8 tiles.
        keep = jax.random.bernoulli(rng_key, keep_prob, (S, B * D)).astype(jnp.uint8)
        out2 = pl.pallas_call(
            functools.partial(_pe_add_dropout_kernel, batch=B, d_model=D,
                              keep_prob=keep_prob),
            out_shape=out_shape,
            grid_spec=pltpu.PrefetchScalarGridSpec(
                num_scalar_prefetch=0,
                grid=grid,
                in_specs=[xo_spec, pe_spec, xo_spec],
                out_specs=xo_spec,
            ),
            compiler_params=compiler_params,
        )(x2, pe_s, keep)

    return out2.reshape(S, B, D)


if __name__ == "__main__":
    # Small shapes consistent with the module's forward: x is (seq, batch, d_model).
    S, B, D = 8, 2, 32
    MAX_LEN = 1000

    key = jax.random.PRNGKey(0)
    kx, kdrop = jax.random.split(key)
    x = jax.random.normal(kx, (S, B, D), dtype=jnp.float32)
    pe = make_positional_encoding_table(MAX_LEN, D)

    expected = x + pe[:S][:, None, :]

    # Eval mode: dropout is identity.
    out_eval = jax.block_until_ready(
        positional_encoding(x, pe, dropout_p=0.1, training=False))
    assert out_eval.shape == (S, B, D)
    assert jnp.allclose(out_eval, expected, atol=1e-6, rtol=1e-6)

    # Training mode: fused inverted dropout with a deterministic jax.random mask.
    p = 0.1
    keep_prob = 1.0 - p
    out_train = jax.block_until_ready(
        positional_encoding(x, pe, dropout_p=p, training=True, rng_key=kdrop))
    keep_mask = jax.random.bernoulli(kdrop, keep_prob, (S, B * D)).reshape(S, B, D)
    expected_train = jnp.where(keep_mask, expected * (1.0 / keep_prob), 0.0)
    assert out_train.shape == (S, B, D)
    assert jnp.allclose(out_train, expected_train, atol=1e-6, rtol=1e-6)

    print("KERNEL_OK")
</pallas_src>

<mosaic_0001>
module attributes {stable_mosaic.version = 11 : i64} {
  func.func @_pe_add_kernel(%arg0: i32, %arg1: memref<8x64xf32, #tpu.memory_space<vmem>>, %arg2: memref<8x32xf32, #tpu.memory_space<vmem>>, %arg3: memref<8x64xf32, #tpu.memory_space<vmem>>) attributes {dimension_semantics = [#tpu.dimension_semantics<parallel>], iteration_bounds = array<i64: 1>, scalar_prefetch = 0 : i64, scratch_operands = 0 : i64, tpu.core_type = #tpu.core_type<tc>, window_params = [{transform_indices = @transform_0, window_bounds = array<i64: 8, 64>}, {transform_indices = @transform_1, window_bounds = array<i64: 8, 32>}, {transform_indices = @transform_2, window_bounds = array<i64: 8, 64>}]} {
    %c0 = arith.constant 0 : index
    %c0_0 = arith.constant 0 : index
    %0 = vector.load %arg2[%c0, %c0_0] : memref<8x32xf32, #tpu.memory_space<vmem>>, vector<8x32xf32>
    %c0_1 = arith.constant 0 : index
    %c0_2 = arith.constant 0 : index
    %1 = vector.load %arg1[%c0_1, %c0_2] : memref<8x64xf32, #tpu.memory_space<vmem>>, vector<8x32xf32>
    %2 = arith.addf %1, %0 : vector<8x32xf32>
    %c0_3 = arith.constant 0 : index
    %c0_4 = arith.constant 0 : index
    %3 = vector.load %arg3[%c0_3, %c0_4] : memref<8x64xf32, #tpu.memory_space<vmem>>, vector<8x32xf32>
    tpu.vector_store %arg3[%c0_3, %c0_4], %2 {strides = array<i32>} : memref<8x64xf32, #tpu.memory_space<vmem>>, vector<8x32xf32>,
    %c0_5 = arith.constant 0 : index
    %c32 = arith.constant 32 : index
    %4 = vector.load %arg1[%c0_5, %c32] : memref<8x64xf32, #tpu.memory_space<vmem>>, vector<8x32xf32>
    %5 = arith.addf %4, %0 : vector<8x32xf32>
    %c0_6 = arith.constant 0 : index
    %c32_7 = arith.constant 32 : index
    %6 = vector.load %arg3[%c0_6, %c32_7] : memref<8x64xf32, #tpu.memory_space<vmem>>, vector<8x32xf32>
    tpu.vector_store %arg3[%c0_6, %c32_7], %5 {strides = array<i32>} : memref<8x64xf32, #tpu.memory_space<vmem>>, vector<8x32xf32>,
    return
  }
  func.func @transform_0(%arg0: i32) -> (i32, i32) {
    %c0_i32 = arith.constant 0 : i32
    %c0_i32_0 = arith.constant 0 : i32
    return %arg0, %c0_i32 : i32, i32
  }
  func.func @transform_1(%arg0: i32) -> (i32, i32) {
    %c0_i32 = arith.constant 0 : i32
    %c0_i32_0 = arith.constant 0 : i32
    return %arg0, %c0_i32 : i32, i32
  }
  func.func @transform_2(%arg0: i32) -> (i32, i32) {
    %c0_i32 = arith.constant 0 : i32
    %c0_i32_0 = arith.constant 0 : i32
    return %arg0, %c0_i32 : i32, i32
  }
}

</mosaic_0001>

<bundles_post_ra>
// kernel: tpu_custom_call.1
= control target key start
LH: loop header
LB: loop body
LE: loop exit
PB: predicated region body
PF: predicated region fallthrough
CT: control target
= control target key end

     0   :  { %7 = vsyncpa [#allocation3], 0  ;;  %s181_s0 = inlined_call_operand.hbm [shape: f32[8,64], index: 0, kind: input, shape index: {}]   ;;  %s182_s1 = inlined_call_operand.hbm [shape: f32[8,32], index: 1, kind: input, shape index: {}]   ;;  %s183_s2 = inlined_call_operand.hbm [shape: f32[8,64], index: 2, kind: output, shape index: {}]  }
   0x1   :  { %8 = vsyncpa [#allocation6], 0 }
   0x2   :  { %9 = vsyncpa [#allocation4], 0  ;;  %s15_s11 = sshll.u32 %s181_s0, 4  ;;  %s153_s12 = smov [#allocation2]   ;;  %s16_s11 = int_to_ptr.hbm [resolvable:$true] %s15_s11 }
   0x3   :  { %s17_s13 = sshll.u32 %s153_s12, 4  ;;  %s26_s16 = sshll.u32 %s182_s1, 4  ;;  %s18_s13 = int_to_ptr.vmem [resolvable:$true] %s17_s13  ;;  %s27_s16 = int_to_ptr.hbm [resolvable:$true] %s26_s16 }
   0x4   :  { %20 = dma.hbm_to_vmem [thread:$0]  %s16_s11, 128, %s18_s13, [#allocation3]  }
   0x5   :  { %s154_s17 = smov [#allocation5]  }
   0x6   :  { %s28_s18 = sshll.u32 %s154_s17, 4  ;;  %s29_s18 = int_to_ptr.vmem [resolvable:$true] %s28_s18 }
   0x7   :  { %31 = dma.hbm_to_vmem [thread:$0]  %s27_s16, 128, %s29_s18, [#allocation6]  }
   0x8   :  { %147 = dma.done.wait [#allocation3], 128  }
   0x9   :  { %148 = vsyncadd [#allocation3], 4294967168 }
   0xa   :  { %149 = dma.done.wait [#allocation6], 128  }
   0xb   :  { %150 = vsyncadd [#allocation6], 4294967168  ;;  %v40_v0 = vld [vmem:[#allocation5] sm:$0xff]  ;;  %v41_v1 = vld [vmem:[#allocation2] sm:$0xff]  ;;  %vm43_vm0 = vcmask 261120   ;;  %s155_s0 = smov 32  }
   0xc   :  { %v42_v2 = vadd.f32 %v41_v1, %v40_v0  ;;  %47 = vrot.lane.b32.xlu0 %v40_v0, %s155_s0  ;;  %s156_s19 = smov [#allocation7]   ;;  %s60_s22 = sshll.u32 %s183_s2, 4  ;;  %vm51_vm1 = vcmask 523520   ;;  %s61_s22 = int_to_ptr.hbm [resolvable:$true] %s60_s22 }
   0xd   :  { %s58_s20 = sshll.u32 %s156_s19, 4  ;;  %s59_s20 = int_to_ptr.vmem [resolvable:$true] %s58_s20 }
   0xe   :  { %44 = vst.msk [vmem:[#allocation7] sm:$0xff] %vm43_vm0, %v42_v2 }
  0x7e   :  { %v48_v3 = vpop.permute.xlu0 %47 }
  0x7f   :  { %v50_v4 = vadd.f32 %v48_v3, %v41_v1 }
  0x81   :  { %52 = vst.msk [vmem:[#allocation7] sm:$0xff] %vm51_vm1, %v50_v4 }
  0x82   :  { %63 = dma.vmem_to_hbm [thread:$0]  %s59_s20, 128, %s61_s22, [#allocation4]  }
  0x83   :  { %151 = dma.done.wait [#allocation4], 128  }
  0x84   :  { %152 = vsyncadd [#allocation4], 4294967168 }
  0x85   :  { %68 = vsyncpa [#allocation3], 1 }
  0x86   :  { %69 = vsyncpa [#allocation6], 1 }
  0x87   :  { %70 = vsyncpa [#allocation4], 1 }

</bundles_post_ra>
